<compile_context>
chip_gen: v7x
topology: tpu7x:2x2x1
jax: 0.10.0
libtpu: 0.0.40
codegen_flags: <defaults>
</compile_context>

<pallas_src>
import functools

import jax
import jax.numpy as jnp
from jax.experimental import pallas as pl
from jax.experimental.pallas import tpu as pltpu


def _round_up(x, m):
    return (x + m - 1) // m * m


def _maxpool_kernel(x_ref, o_ref, *, kh_size, kw_size, width):
    """One block: rows are (n, c, h_out) triples, lanes are the KH*W inputs.

    x_ref: (TM, KH*W)    row r holds the KH full-width input rows feeding
                         output row r, concatenated along lanes.
    o_ref: (TM, W-KW+1)  stride-1 sliding-window max (valid at lanes j*KW).
    """
    w_safe = width - kw_size + 1
    # KH-direction max: contiguous lane slices, elementwise max (VPU only).
    row_max = x_ref[:, 0:width]
    for kh in range(1, kh_size):
        row_max = jnp.maximum(row_max, x_ref[:, kh * width:(kh + 1) * width])
    # KW-direction max: width-KW sliding window via shifted contiguous slices.
    pooled = row_max[:, 0:w_safe]
    for kw in range(1, kw_size):
        pooled = jnp.maximum(pooled, row_max[:, kw:kw + w_safe])
    o_ref[...] = pooled


_VMEM_BUDGET_BYTES = 12 * 1024 * 1024   # safe under v5e's 16 MiB scoped default


def _pick_tile_rows(m_rows, in_row_lanes, out_row_lanes, itemsize):
    """Balanced row tile: multiple of the dtype sublane tile, ~12 MiB of
    double-buffered VMEM (in + out), and >= 2 grid steps when possible."""
    mult = 8 * max(1, 4 // itemsize)            # f32: 8, bf16: 16, int8: 32
    # Per-row VMEM cost with lane padding to 128 and x2 double buffering.
    per_row = 2 * itemsize * (_round_up(in_row_lanes, 128) +
                              _round_up(out_row_lanes, 128))
    cap = max(mult, _VMEM_BUDGET_BYTES // per_row // mult * mult)
    # Keep >= 2 grid steps so both v7x TensorCores (and pipelining) engage.
    cap = min(cap, max(mult, _round_up(pl.cdiv(m_rows, 2), mult)))
    # Balanced tiles: never pad the grid up by a whole extra tile.
    n_blocks = pl.cdiv(m_rows, cap)
    tm = _round_up(pl.cdiv(m_rows, n_blocks), mult)
    if tm >= m_rows:                            # single full-extent block
        return m_rows
    return tm


@functools.partial(jax.jit, static_argnames=("kernel_size",))
def maxpool2d_pallas(x, kernel_size=(2, 2)):
    """MaxPool2d forward with the PyTorch-module semantics of the reference:
    stride == kernel_size, padding=0, dilation=1, ceil_mode=False.

    x: (N, C, H, W) -> (N, C, H // KH, W // KW), same dtype, exact max.
    """
    kh, kw = ((kernel_size, kernel_size) if isinstance(kernel_size, int)
              else tuple(kernel_size))
    n, c, h, w = x.shape
    h_out, w_out = h // kh, w // kw
    if n * c * h_out * w_out == 0:              # degenerate shapes -> empty out
        return jnp.zeros((n, c, h_out, w_out), x.dtype)

    if h != h_out * kh:                         # ragged H: floor-crop (one copy)
        x = x[:, :, :h_out * kh, :]
    # Free reshape (contiguous split/merge): row r = (n, c, h_out) triple,
    # lanes = the KH input rows (full width W) feeding output row r.
    # Ragged W needs no crop: lanes past (w_out-1)*kw + kw-1 are never used.
    m_rows = n * c * h_out
    x2d = x.reshape(m_rows, kh * w)

    w_safe = w - kw + 1                         # sliding-window-max width
    tm = _pick_tile_rows(m_rows, kh * w, w_safe, x.dtype.itemsize)
    grid = (pl.cdiv(m_rows, tm),)

    io_bytes = (m_rows * kh * w + m_rows * w_safe) * x.dtype.itemsize
    pooled = pl.pallas_call(
        functools.partial(_maxpool_kernel, kh_size=kh, kw_size=kw, width=w),
        out_shape=jax.ShapeDtypeStruct((m_rows, w_safe), x.dtype),
        grid=grid,
        in_specs=[pl.BlockSpec((tm, kh * w), lambda i: (i, 0))],
        out_specs=pl.BlockSpec((tm, w_safe), lambda i: (i, 0)),
        compiler_params=pltpu.CompilerParams(
            dimension_semantics=("parallel",)),
        cost_estimate=pl.CostEstimate(
            flops=m_rows * ((kh - 1) * w + (kw - 1) * w_safe),
            transcendentals=0,
            bytes_accessed=io_bytes),
    )(x2d)

    # Final stride-KW lane subsample: pure data movement on an array 1/KH the
    # size of x; XLA fuses it with the reshape below.
    # TODO(synk): doing this compaction inside the kernel (lane gather or a
    # strided store) would remove the remaining 1/KH-sized HBM round trip.
    out = pooled[:, ::kw] if kw > 1 else pooled
    return out.reshape(n, c, h_out, w_out)


# TODO(synk): local_grad / backward (training-time gradient bookkeeping of the
# reference Module) are not part of the forward pass and are not implemented.


if __name__ == "__main__":
    key = jax.random.PRNGKey(0)
    k1, k2, k3 = jax.random.split(key, 3)

    # Shapes consistent with the module: N=2, C=4, H=W=16, 2x2 pooling.
    x = jax.random.normal(k1, (2, 4, 16, 16), jnp.float32)
    out = jax.block_until_ready(maxpool2d_pallas(x, (2, 2)))
    ref = x.reshape(2, 4, 8, 2, 8, 2).max(axis=(3, 5))
    assert out.shape == (2, 4, 8, 8)
    assert jnp.array_equal(out, ref)

    # Ragged H/W with a non-square window: exercises the partial final grid
    # block, the H floor-crop and the un-cropped ragged-W lanes.
    x2 = jax.random.normal(k2, (2, 3, 35, 46), jnp.float32)
    out2 = jax.block_until_ready(maxpool2d_pallas(x2, (2, 3)))
    ref2 = x2[:, :, :34, :45].reshape(2, 3, 17, 2, 15, 3).max(axis=(3, 5))
    assert out2.shape == (2, 3, 17, 15)
    assert jnp.array_equal(out2, ref2)

    # bf16 path (HBM-bound op -> ~2x from halving bytes); the max stays exact.
    x3 = jax.random.normal(k3, (1, 3, 16, 20), jnp.float32).astype(jnp.bfloat16)
    out3 = jax.block_until_ready(maxpool2d_pallas(x3, (2, 2)))
    ref3 = x3.reshape(1, 3, 8, 2, 10, 2).max(axis=(3, 5))
    assert out3.shape == (1, 3, 8, 10)
    assert jnp.array_equal(out3, ref3)

    print("KERNEL_OK")
</pallas_src>

<mosaic_0001>
module attributes {stable_mosaic.version = 11 : i64} {
  func.func @_maxpool_kernel(%arg0: i32, %arg1: memref<32x32xf32, #tpu.memory_space<vmem>>, %arg2: memref<32x15xf32, #tpu.memory_space<vmem>>) attributes {dimension_semantics = [#tpu.dimension_semantics<parallel>], iteration_bounds = array<i64: 2>, scalar_prefetch = 0 : i64, scratch_operands = 0 : i64, tpu.core_type = #tpu.core_type<tc>, window_params = [{transform_indices = @transform_0, window_bounds = array<i64: 32, 32>}, {transform_indices = @transform_1, window_bounds = array<i64: 32, 15>}]} {
    %c0 = arith.constant 0 : index
    %c0_0 = arith.constant 0 : index
    %0 = vector.load %arg1[%c0, %c0_0] : memref<32x32xf32, #tpu.memory_space<vmem>>, vector<32x16xf32>
    %c0_1 = arith.constant 0 : index
    %c16 = arith.constant 16 : index
    %1 = vector.load %arg1[%c0_1, %c16] : memref<32x32xf32, #tpu.memory_space<vmem>>, vector<32x16xf32>
    %2 = arith.maximumf %0, %1 : vector<32x16xf32>
    %3 = vector.extract_strided_slice %2 {offsets = [0, 0], sizes = [32, 15], strides = [1, 1]} : vector<32x16xf32> to vector<32x15xf32>
    %4 = vector.extract_strided_slice %2 {offsets = [0, 1], sizes = [32, 15], strides = [1, 1]} : vector<32x16xf32> to vector<32x15xf32>
    %5 = arith.maximumf %3, %4 : vector<32x15xf32>
    %c0_2 = arith.constant 0 : index
    %c0_3 = arith.constant 0 : index
    %6 = vector.load %arg2[%c0_2, %c0_3] : memref<32x15xf32, #tpu.memory_space<vmem>>, vector<32x15xf32>
    tpu.vector_store %arg2[%c0_2, %c0_3], %5 {strides = array<i32>} : memref<32x15xf32, #tpu.memory_space<vmem>>, vector<32x15xf32>,
    return
  }
  func.func @transform_0(%arg0: i32) -> (i32, i32) {
    %c0_i32 = arith.constant 0 : i32
    %c0_i32_0 = arith.constant 0 : i32
    return %arg0, %c0_i32 : i32, i32
  }
  func.func @transform_1(%arg0: i32) -> (i32, i32) {
    %c0_i32 = arith.constant 0 : i32
    %c0_i32_0 = arith.constant 0 : i32
    return %arg0, %c0_i32 : i32, i32
  }
}

</mosaic_0001>

<bundles_post_ra>
// kernel: maxpool2d_pallas.1
= control target key start
LH: loop header
LB: loop body
LE: loop exit
PB: predicated region body
PF: predicated region fallthrough
CT: control target
= control target key end

     0   :  { %s266_s6 = smov 0   ;;  %s283_s0 = inlined_call_operand.vmem [shape: f32[64,32], index: 0, kind: input, shape index: {}]   ;;  %s284_s1 = inlined_call_operand.vmem [shape: f32[64,15], index: 1, kind: output, shape index: {}]  }
   0x1 LB: > { %s225_s7 = sadd.s32 4294967295, %s252_s6   ;;  %p229_p0 = scmp.ge.s32.totalorder %s252_s6, 1  ;;  %s252_s6 = sphi %s266_s6, %s11_s6  }
   0x2   : > { %p88_p1 = scmp.lt.s32.totalorder %s252_s6, 3 }
   0x4   : > { %p89_p2 = pnand %p229_p0, %p88_p1 }
   0x5   : > { %s230_s8 = sshll.u32 (!%p89_p2), %s225_s7, 2  ;;  %s254_s13 = smov (!%p89_p2), 112   ;;  %vm164_vm0 = vcmask (!%p89_p2), 121856  }
   0x6   : > { %92 = sbr.rel (%p89_p2) target bundleno = 260 (0x104), region = 24  ;;  %p109_p3 = scmp.lt.s32.totalorder (!%p89_p2), %s230_s8, 7 }
   0x7   : > { %s255_s14 = smov (!%p89_p2), 127  }
   0xd   : > { %s286_s8 = smov (!%p109_p3, %s230_s8), 7 }
   0xe   : > { %s231_s9 = sshll.u32 %s286_s8, 3 }
   0xf   : > { %s112_s12 = scalar_lea.vmem %s283_s0, %s231_s9  ;;  %s118_s17 = scalar_lea.vmem %s284_s1, %s231_s9 }
  0x10   : > { %v120_v0 = vld [vmem:[%s112_s12] sm:$0xff]  ;;  %v122_v1 = vld [vmem:[%s112_s12 + $0x10] sm:$0xff]  ;;  %v121_v2 = vld [vmem:[%s112_s12 + $0x8] sm:$0xff] }
  0x11   : > { %128 = vrot.lane.b32.xlu0 %v120_v0, %s254_s13  ;;  %132 = vrot.lane.b32.xlu1 %v122_v1, %s254_s13  ;;  %v123_v3 = vld [vmem:[%s112_s12 + $0x18] sm:$0xff] }
  0x15   : > { %130 = vrot.lane.b32.xlu0 %v121_v2, %s254_s13  ;;  %134 = vrot.lane.b32.xlu1 %v123_v3, %s254_s13 }
  0x83   : > { %v129_v4 = vpop.permute.xlu0 %128  ;;  %v133_v5 = vpop.permute.xlu1 %132 }
  0x84   : > { %v140_v6 = vmax.f32 %v120_v0, %v129_v4  ;;  %v142_v7 = vmax.f32 %v122_v1, %v133_v5 }
  0x86   : > { %148 = vrot.lane.b32.xlu0 %v140_v6, %s255_s14 }
  0x87   : > { %v131_v8 = vpop.permute.xlu0 %130  ;;  %v135_v9 = vpop.permute.xlu1 %134 }
  0x88   : > { %v141_v10 = vmax.f32 %v121_v2, %v131_v8  ;;  %v143_v11 = vmax.f32 %v123_v3, %v135_v9 }
  0x8a   : > { %152 = vrot.lane.b32.xlu0 %v142_v7, %s255_s14  ;;  %150 = vrot.lane.b32.xlu1 %v141_v10, %s255_s14 }
  0x8e   : > { %154 = vrot.lane.b32.xlu1 %v143_v11, %s255_s14 }
  0xf8   : > { %v149_v12 = vpop.permute.xlu0 %148 }
  0xf9   : > { %v160_v13 = vmax.f32 %v140_v6, %v149_v12 }
  0xfb   : > { %165 = vst.msk [vmem:[%s118_s17] sm:$0xff] %vm164_vm0, %v160_v13 }
  0xfc   : > { %v151_v14 = vpop.permute.xlu1 %150  ;;  %v153_v15 = vpop.permute.xlu0 %152 }
  0xfd   : > { %v161_v16 = vmax.f32 %v141_v10, %v151_v14  ;;  %v162_v17 = vmax.f32 %v142_v7, %v153_v15 }
  0xff   : > { %166 = vst.msk [vmem:[%s118_s17 + $0x8] sm:$0xff] %vm164_vm0, %v161_v16  ;;  %167 = vst.msk [vmem:[%s118_s17 + $0x10] sm:$0xff] %vm164_vm0, %v162_v17 }
 0x100   : > { %v155_v18 = vpop.permute.xlu1 %154 }
 0x101   : > { %v163_v19 = vmax.f32 %v143_v11, %v155_v18 }
 0x103   : > { %168 = vst.msk [vmem:[%s118_s17 + $0x18] sm:$0xff] %vm164_vm0, %v163_v19 }
 0x104 PF: > { %s11_s6 = sadd.s32 1, %s252_s6  }
 0x105   : > { %p8_p4 = scmp.ge.s32.totalorder %s11_s6, 4  }
 0x107   :  { %10 = sbr.rel (!%p8_p4) target bundleno = 1 (0x1), region = 54 }

</bundles_post_ra>
